<compile_context>
chip_gen: v7x
topology: tpu7x:2x2x1
jax: 0.10.0
libtpu: 0.0.40
codegen_flags: <defaults>
</compile_context>

<pallas_src>
import jax
import jax.numpy as jnp
from jax.experimental import pallas as pl
from jax.experimental.pallas import tpu as pltpu

EPS = 1e-5  # nn.BatchNorm2d default


# ----------------------------- Pallas kernels -----------------------------

def _bin_conv_stats_kernel(a_ref, w_ref, o_ref, sum_ref, sq_ref):
    # a_ref: (tm, Kp) bf16 binarized patches; w_ref: (Kp, C_out) f32 (or bf16 if opted in)
    a = a_ref[...].astype(w_ref.dtype)
    acc = jnp.dot(a, w_ref[...], preferred_element_type=jnp.float32)
    o_ref[...] = acc
    # fused BN statistics epilogue: per-tile per-channel sum and sum of squares
    s = jnp.sum(acc, axis=0, keepdims=True)            # (1, C_out)
    q = jnp.sum(acc * acc, axis=0, keepdims=True)      # (1, C_out)
    sum_ref[...] = s[None]                              # (1, 1, C_out)
    sq_ref[...] = q[None]


def _bn_residual_kernel(c_ref, r_ref, scale_ref, shift_ref, o_ref):
    # pure streaming: y = conv * scale + shift + residual  (scale/shift fold mean/var/gamma/beta)
    o_ref[...] = c_ref[...] * scale_ref[...] + shift_ref[...] + r_ref[...]


# ----------------------------- tiling helpers -----------------------------

def _round_up(x, m):
    return (x + m - 1) // m * m


def _pick_m_tile(M, Kp, C_out, a_itemsize, budget=40 * 1024 * 1024):
    # 512-1024 row tiles are near HBM roofline; shrink if the double-buffered blocks
    # would not fit a v7x-safe VMEM budget.
    tm = 512 if M >= 1024 else (256 if M >= 512 else 128)
    while tm > 128:
        need = (2 * tm * Kp * a_itemsize          # A double-buffered (bf16)
                + 2 * Kp * C_out * 4              # weight
                + 2 * tm * C_out * 4)             # conv output
        if need <= budget:
            break
        tm //= 2
    return tm


def _pick_row_tile(R, L, budget=40 * 1024 * 1024):
    # largest multiple-of-8 divisor of R fitting the VMEM budget, preferring >=2 grid steps
    cap = max(8, min(512, (budget // (L * 4 * 8)) // 8 * 8))
    cands = [d for d in range(8, min(cap, R) + 1, 8) if R % d == 0]
    if not cands:
        return R
    multi = [d for d in cands if R // d >= 2]
    return multi[-1] if multi else cands[-1]


def _vmem_limit(nbytes):
    # generous headroom, but never above the v7x physical 64 MiB
    return int(min(64 << 20, max(32 << 20, int(nbytes * 1.5))))


# ----------------------------- wrapper (glue) -----------------------------

def bin_relu_conv_bn(x_nchw, weight, gamma, beta, *, kernel_size, stride, padding,
                     use_bf16_weights=False):
    N, C_in, H, W = x_nchw.shape
    C_out = weight.shape[0]
    K = kernel_size

    Ho = (H + 2 * padding - K) // stride + 1
    Wo = (W + 2 * padding - K) // stride + 1
    M = N * Ho * Wo
    Kdim = K * K * C_in
    Kp = _round_up(Kdim, 128)          # pad contraction dim to full lanes (zeros are exact)

    # --- binarize first (exact in bf16), then im2col (pure-JAX glue) ---
    x = jnp.transpose(x_nchw, (0, 2, 3, 1))                    # NHWC
    xb = jnp.sign(x).astype(jnp.bfloat16)                      # {-1, 0, +1}: exact in bf16
    xp = jnp.pad(xb, ((0, 0), (padding, padding), (padding, padding), (0, 0)))
    patches = []
    for i in range(K):
        for j in range(K):
            patches.append(xp[:, i:i + stride * Ho:stride, j:j + stride * Wo:stride, :])
    A = jnp.stack(patches, axis=3).reshape(M, Kdim)            # (M, K*K*C_in) bf16

    # conv weight (C_out, C_in, K, K) -> (K*K*C_in, C_out), row order matches A's (kk, c) order
    w_dtype = jnp.bfloat16 if use_bf16_weights else jnp.float32
    w2 = jnp.transpose(weight, (2, 3, 1, 0)).reshape(Kdim, C_out).astype(w_dtype)
    w2 = jnp.pad(w2, ((0, Kp - Kdim), (0, 0)))

    # --- M tiling: no tm=M fallback; pad M to a tile multiple (zero rows -> zero conv rows) ---
    tm = _pick_m_tile(M, Kp, C_out, A.dtype.itemsize)
    Mp = _round_up(M, tm)
    A = jnp.pad(A, ((0, Mp - M), (0, Kp - Kdim)))
    nt = Mp // tm

    conv_vmem = (2 * tm * Kp * A.dtype.itemsize + 2 * Kp * C_out * w2.dtype.itemsize
                 + 2 * tm * C_out * 4 + 4 * 2 * C_out * 4)
    conv_full, psum, psq = pl.pallas_call(
        _bin_conv_stats_kernel,
        out_shape=(jax.ShapeDtypeStruct((Mp, C_out), jnp.float32),
                   jax.ShapeDtypeStruct((nt, 1, C_out), jnp.float32),
                   jax.ShapeDtypeStruct((nt, 1, C_out), jnp.float32)),
        grid=(nt,),
        in_specs=[pl.BlockSpec((tm, Kp), lambda i: (i, 0)),
                  pl.BlockSpec((Kp, C_out), lambda i: (0, 0))],
        out_specs=(pl.BlockSpec((tm, C_out), lambda i: (i, 0)),
                   pl.BlockSpec((1, 1, C_out), lambda i: (i, 0, 0)),
                   pl.BlockSpec((1, 1, C_out), lambda i: (i, 0, 0))),
        compiler_params=pltpu.CompilerParams(
            dimension_semantics=("parallel",),
            vmem_limit_bytes=_vmem_limit(conv_vmem)),
    )(A, w2)

    # --- BN statistics from per-tile partial sums (tiny glue: nt x C_out elements) ---
    ssum = jnp.sum(psum.reshape(nt, C_out), axis=0)
    ssq = jnp.sum(psq.reshape(nt, C_out), axis=0)
    mean = ssum / M                                            # padded rows contribute zero
    var = jnp.maximum(ssq / M - mean * mean, 0.0)              # biased (train-mode) variance
    inv = jax.lax.rsqrt(var + EPS)
    scale = gamma * inv
    shift = beta - mean * scale

    # --- residual path (glue): AvgPool2d(2,2) when stride==2, identity otherwise ---
    if stride == 2:
        res = x.reshape(N, Ho, 2, Wo, 2, C_in).mean(axis=(2, 4))
    else:
        res = x

    # lane-dense slabs: (N*Ho, Wo*C_out); the torch module requires C_in == C_out here
    R, L = N * Ho, Wo * C_out
    conv2 = (conv_full if Mp == M else conv_full[:M]).reshape(R, L)
    res2 = res.reshape(R, L).astype(jnp.float32)
    scale2 = jnp.tile(scale, Wo).reshape(1, L).astype(jnp.float32)
    shift2 = jnp.tile(shift, Wo).reshape(1, L).astype(jnp.float32)

    tr = _pick_row_tile(R, L)
    bn_vmem = 2 * 3 * tr * L * 4 + 2 * 2 * L * 4
    out2 = pl.pallas_call(
        _bn_residual_kernel,
        out_shape=jax.ShapeDtypeStruct((R, L), jnp.float32),
        grid=(R // tr,),
        in_specs=[pl.BlockSpec((tr, L), lambda i: (i, 0)),
                  pl.BlockSpec((tr, L), lambda i: (i, 0)),
                  pl.BlockSpec((1, L), lambda i: (0, 0)),
                  pl.BlockSpec((1, L), lambda i: (0, 0))],
        out_specs=pl.BlockSpec((tr, L), lambda i: (i, 0)),
        compiler_params=pltpu.CompilerParams(
            dimension_semantics=("parallel",),
            vmem_limit_bytes=_vmem_limit(bn_vmem)),
    )(conv2, res2, scale2, shift2)

    out = out2.reshape(N, Ho, Wo, C_out)
    return jnp.transpose(out, (0, 3, 1, 2))                    # back to NCHW


# ----------------------------- pure-JAX reference -----------------------------

def reference(x_nchw, weight, gamma, beta, *, kernel_size, stride, padding):
    xb = jnp.sign(x_nchw)
    conv = jax.lax.conv_general_dilated(
        xb, weight, window_strides=(stride, stride),
        padding=[(padding, padding), (padding, padding)],
        dimension_numbers=("NCHW", "OIHW", "NCHW"))
    mean = conv.mean(axis=(0, 2, 3), keepdims=True)
    var = ((conv - mean) ** 2).mean(axis=(0, 2, 3), keepdims=True)
    y = ((conv - mean) * jax.lax.rsqrt(var + EPS)
         * gamma.reshape(1, -1, 1, 1) + beta.reshape(1, -1, 1, 1))
    if stride == 2:
        N, C, H, W = x_nchw.shape
        res = x_nchw.reshape(N, C, H // 2, 2, W // 2, 2).mean(axis=(3, 5))
    else:
        res = x_nchw
    return y + res


# ----------------------------- demo -----------------------------

if __name__ == "__main__":
    # module config: C_in = C_out (required by the residual add), kernel 3x3, stride 1, pad 1
    N, C_in, C_out, H, W = 2, 8, 8, 16, 16
    kernel_size, stride, padding = 3, 1, 1

    key = jax.random.PRNGKey(0)
    kx, kw = jax.random.split(key)
    x = jax.random.normal(kx, (N, C_in, H, W), dtype=jnp.float32)
    weight = 0.1 * jax.random.normal(kw, (C_out, C_in, kernel_size, kernel_size), dtype=jnp.float32)
    gamma = jnp.ones((C_out,), dtype=jnp.float32)   # BatchNorm2d affine init
    beta = jnp.zeros((C_out,), dtype=jnp.float32)

    out = bin_relu_conv_bn(x, weight, gamma, beta,
                           kernel_size=kernel_size, stride=stride, padding=padding)
    out = jax.block_until_ready(out)

    ref = reference(x, weight, gamma, beta,
                    kernel_size=kernel_size, stride=stride, padding=padding)
    assert out.shape == (N, C_out, H, W)
    assert jnp.allclose(out, ref, atol=1e-4, rtol=1e-4), float(jnp.max(jnp.abs(out - ref)))

    print("KERNEL_OK")
</pallas_src>

<mosaic_0001>
module attributes {stable_mosaic.version = 11 : i64} {
  func.func @_bin_conv_stats_kernel(%arg0: i32, %arg1: memref<256x128xbf16, #tpu.memory_space<vmem>>, %arg2: memref<128x8xf32, #tpu.memory_space<vmem>>, %arg3: memref<256x8xf32, #tpu.memory_space<vmem>>, %arg4: memref<1x1x8xf32, #tpu.memory_space<vmem>>, %arg5: memref<1x1x8xf32, #tpu.memory_space<vmem>>) attributes {dimension_semantics = [#tpu.dimension_semantics<parallel>], iteration_bounds = array<i64: 2>, scalar_prefetch = 0 : i64, scratch_operands = 0 : i64, tpu.core_type = #tpu.core_type<tc>, window_params = [{transform_indices = @transform_0, window_bounds = array<i64: 256, 128>}, {pipeline_mode = #tpu.pipeline_mode<synchronous>, transform_indices = @transform_1, window_bounds = array<i64: 128, 8>}, {transform_indices = @transform_2, window_bounds = array<i64: 256, 8>}, {transform_indices = @transform_3, window_bounds = array<i64: 1, 1, 8>}, {transform_indices = @transform_4, window_bounds = array<i64: 1, 1, 8>}]} {
    %c0 = arith.constant 0 : index
    %c0_0 = arith.constant 0 : index
    %0 = vector.load %arg1[%c0, %c0_0] : memref<256x128xbf16, #tpu.memory_space<vmem>>, vector<256x128xbf16>
    %1 = arith.extf %0 : vector<256x128xbf16> to vector<256x128xf32>
    %c0_1 = arith.constant 0 : index
    %c0_2 = arith.constant 0 : index
    %2 = vector.load %arg2[%c0_1, %c0_2] : memref<128x8xf32, #tpu.memory_space<vmem>>, vector<128x8xf32>
    %cst = arith.constant dense<0.000000e+00> : vector<256x8xf32>
    %3 = tpu.matmul %1, %2, %cst {dimension_numbers = #tpu.dot_dimension_numbers<[1], [0], [0], [1], [0, 0, 1, 1], [], []>} : vector<256x128xf32>, vector<128x8xf32>, vector<256x8xf32> -> vector<256x8xf32>
    %c0_3 = arith.constant 0 : index
    %c0_4 = arith.constant 0 : index
    %4 = vector.load %arg3[%c0_3, %c0_4] : memref<256x8xf32, #tpu.memory_space<vmem>>, vector<256x8xf32>
    tpu.vector_store %arg3[%c0_3, %c0_4], %3 {strides = array<i32>} : memref<256x8xf32, #tpu.memory_space<vmem>>, vector<256x8xf32>,
    %cst_5 = arith.constant dense<0.000000e+00> : vector<8xf32>
    %5 = vector.multi_reduction <add>, %3, %cst_5 [0] : vector<256x8xf32> to vector<8xf32>
    %6 = vector.shape_cast %5 : vector<8xf32> to vector<1x8xf32>
    %7 = arith.mulf %3, %3 : vector<256x8xf32>
    %cst_6 = arith.constant dense<0.000000e+00> : vector<8xf32>
    %8 = vector.multi_reduction <add>, %7, %cst_6 [0] : vector<256x8xf32> to vector<8xf32>
    %9 = vector.shape_cast %8 : vector<8xf32> to vector<1x8xf32>
    %10 = vector.shape_cast %6 : vector<1x8xf32> to vector<1x1x8xf32>
    %c0_7 = arith.constant 0 : index
    %c0_8 = arith.constant 0 : index
    %c0_9 = arith.constant 0 : index
    %11 = vector.load %arg4[%c0_7, %c0_8, %c0_9] : memref<1x1x8xf32, #tpu.memory_space<vmem>>, vector<1x1x8xf32>
    tpu.vector_store %arg4[%c0_7, %c0_8, %c0_9], %10 {strides = array<i32>} : memref<1x1x8xf32, #tpu.memory_space<vmem>>, vector<1x1x8xf32>,
    %12 = vector.shape_cast %9 : vector<1x8xf32> to vector<1x1x8xf32>
    %c0_10 = arith.constant 0 : index
    %c0_11 = arith.constant 0 : index
    %c0_12 = arith.constant 0 : index
    %13 = vector.load %arg5[%c0_10, %c0_11, %c0_12] : memref<1x1x8xf32, #tpu.memory_space<vmem>>, vector<1x1x8xf32>
    tpu.vector_store %arg5[%c0_10, %c0_11, %c0_12], %12 {strides = array<i32>} : memref<1x1x8xf32, #tpu.memory_space<vmem>>, vector<1x1x8xf32>,
    return
  }
  func.func @transform_0(%arg0: i32) -> (i32, i32) {
    %c0_i32 = arith.constant 0 : i32
    %c0_i32_0 = arith.constant 0 : i32
    return %arg0, %c0_i32 : i32, i32
  }
  func.func @transform_1(%arg0: i32) -> (i32, i32) {
    %c0_i32 = arith.constant 0 : i32
    %c0_i32_0 = arith.constant 0 : i32
    %c0_i32_1 = arith.constant 0 : i32
    return %c0_i32, %c0_i32_0 : i32, i32
  }
  func.func @transform_2(%arg0: i32) -> (i32, i32) {
    %c0_i32 = arith.constant 0 : i32
    %c0_i32_0 = arith.constant 0 : i32
    return %arg0, %c0_i32 : i32, i32
  }
  func.func @transform_3(%arg0: i32) -> (i32, i32, i32) {
    %c0_i32 = arith.constant 0 : i32
    %c0_i32_0 = arith.constant 0 : i32
    %c0_i32_1 = arith.constant 0 : i32
    return %arg0, %c0_i32, %c0_i32_0 : i32, i32, i32
  }
  func.func @transform_4(%arg0: i32) -> (i32, i32, i32) {
    %c0_i32 = arith.constant 0 : i32
    %c0_i32_0 = arith.constant 0 : i32
    %c0_i32_1 = arith.constant 0 : i32
    return %arg0, %c0_i32, %c0_i32_0 : i32, i32, i32
  }
}

</mosaic_0001>

<bundles_post_ra>
// kernel: tpu_custom_call.1
= control target key start
LH: loop header
LB: loop body
LE: loop exit
PB: predicated region body
PF: predicated region fallthrough
CT: control target
= control target key end

     0   :  { %10 = vsyncpa [#allocation3], 0  ;;  %s1887_s0 = inlined_call_operand.hbm [shape: bf16[512,128], index: 0, kind: input, shape index: {}]   ;;  %s1888_s1 = inlined_call_operand.vmem [shape: f32[128,8], index: 1, kind: input, shape index: {}]   ;;  %s1889_s2 = inlined_call_operand.vmem [shape: f32[512,8], index: 2, kind: output, shape index: {0}]   ;;  %s1890_s3 = inlined_call_operand.hbm [shape: f32[2,1,8], index: 3, kind: output, shape index: {1}]   ;;  %s1891_s4 = inlined_call_operand.hbm [shape: f32[2,1,8], index: 4, kind: output, shape index: {2}]  }
   0x1   :  { %12 = vsyncpa [#allocation3 + $0x1], 0 }
   0x2   :  { %13 = vsyncpa [#allocation4], 0 }
   0x3   :  { %15 = vsyncpa [#allocation4 + $0x1], 0 }
   0x4   :  { %16 = vsyncpa [#allocation7], 0 }
   0x5   :  { %18 = vsyncpa [#allocation7 + $0x1], 0  ;;  %s1391_s15 = smov 0   ;;  %s1393_s16 = smov 0  }
   0x6   :  { %s1395_s17 = smov 0   ;;  %s1397_s18 = smov 0  }
   0x7 LB: > { %s1412_s19 = sadd.s32 4294967295, %s1359_s18   ;;  %s908_s20 = sadd.s32 4294967294, %s1359_s18   ;;  %s1359_s18 = sphi %s1397_s18, %s1904_s18   ;;  %s1355_s17 = sphi %s1395_s17, %s1903_s17   ;;  %s1351_s16 = sphi %s1393_s16, %s1902_s16   ;;  %s1347_s15 = sphi %s1391_s15, %s1901_s15  }
   0x8   : > { %s1416_s21 = sadd.s32 1, %s1359_s18   ;;  %s31_s22 = sadd.s32 1, %s1355_s17 }
   0x9   : > { %s28_s23 = ssub.s32 %s1359_s18, %s1416_s21  ;;  %p38_p0 = scmp.ne.s32.totalorder %s1355_s17, %s1351_s16 }
   0xa   : > { %p29_p1 = scmp.eq.s32.totalorder %s28_s23, 0  ;;  %p39_p2 = scmp.eq.s32.totalorder %s1359_s18, 0 }
   0xb   : > { %p44_p3 = scmp.ne.s32.totalorder %s1351_s16, %s1347_s15  ;;  %p45_p4 = scmp.eq.s32.totalorder %s1412_s19, 0 }
   0xc   : > { %s1428_s24 = scalar_select %p29_p1, %s1355_s17, %s31_s22  }
   0xd   : > { %p1430_p5 = por %p39_p2, %p38_p0  ;;  %p1434_p6 = por %p45_p4, %p44_p3 }
   0xe   : > { %p115_p7 = scmp.eq.s32.totalorder %s1412_s19, 1  ;;  %p121_p8 = scmp.eq.s32.totalorder %s908_s20, 1 }
   0xf   : > { %p1195_p10 = scmp.lt.s32.totalorder %s1359_s18, 2  ;;  %s170_s29 = sand.u32 1, %s1355_s17  }
  0x10   : > { %p1441_p11 = por %p115_p7, %p38_p0  ;;  %p1445_p12 = por %p121_p8, %p44_p3 }
  0x11   : > { %s922_s30 = sshll.u32 %s1359_s18, 11  ;;  %s911_s5 = sshll.u32 %s170_s29, 7 }
  0x12   : > { %s1895_s27 = scalar_select %p1441_p11, 1, 0 }
  0x13   : > { %s1896_s28 = scalar_select %p1445_p12, 1, 0 }
  0x14   : > { %s1454_s8 = scalar_lea.hbm %s1887_s0, %s922_s30  ;;  %s174_s9 = scalar_lea.vmem [#allocation2], %s911_s5 }
  0x15   : > { %s181_s10 = sshll.u32 %s174_s9, 4  ;;  %p1458_p13 = pnand %p1195_p10, %p1430_p5  ;;  %s1462_s10 = int_to_ptr.vmem [resolvable:$true] %s181_s10 }
  0x16   : > { %s1464_s12 = scalar_lea.sflag [#allocation3], %s170_s29  ;;  %s1231_s13 = scalar_lea.hbm %s1454_s8, 2048 }
  0x17   : > { %p1232_p0 = scmp.ne.s32.totalorder %s1454_s8, %s1231_s13  ;;  %p1233_p1 = pneg %p1458_p13 }
  0x18   : > { %s1236_s22 = scalar_lea.hbm %s1887_s0, 4096  ;;  %p1237_p4 = scmp.lt.u32.totalorder %s1454_s8, %s1887_s0 }
  0x19   : > { %p1234_p2 = pnand %p1233_p1, %p1232_p0  ;;  %p1238_p5 = scmp.lt.u32.totalorder %s1236_s22, %s1231_s13 }
  0x1a   : > { %p1240_p8 = scmp.lt.u32.totalorder %s1231_s13, %s1454_s8 }
  0x1b   : > { %p1235_p3 = pneg %p1234_p2  ;;  %p1239_p7 = por %p1238_p5, %p1237_p4 }
  0x1d   : > { %p1241_p10 = por %p1240_p8, %p1239_p7 }
  0x1f   : > { %p1242_p9 = pnand %p1241_p10, %p1235_p3 }
  0x21   : > { %1245 = shalt.err (!%p1242_p9)
}
  0x22   : > { %s1246_s29 = scalar_lea.vmem %s1462_s10, 2048  ;;  %s1361_s30 = smov [#allocation2]  }
  0x23   : > { %p1247_p0 = scmp.ne.s32.totalorder %s1462_s10, %s1246_s29  ;;  %s1251_s5 = sshll.u32 %s1361_s30, 4  ;;  %s1252_s5 = int_to_ptr.vmem [resolvable:$false] %s1251_s5 }
  0x24   : > { %s1253_s6 = scalar_lea.vmem %s1252_s5, 4096  ;;  %p1254_p11 = scmp.lt.s32.totalorder %s1462_s10, %s1252_s5 }
  0x25   : > { %p1249_p2 = pnand %p1247_p0, %p1233_p1  ;;  %p1255_p4 = scmp.lt.s32.totalorder %s1253_s6, %s1246_s29 }
  0x27   : > { %p1250_p12 = pneg %p1249_p2  ;;  %p1256_p5 = por %p1255_p4, %p1254_p11 }
  0x29   : > { %p1257_p7 = pnand %p1256_p5, %p1250_p12 }
  0x2b   : > { %1260 = shalt.err (!%p1257_p7)
}
  0x2c   : > { %s1362_s7 = smov 64   ;;  %s1363_s9 = smov 4  }
  0x2d   : > { %1187 = dma.hbm_to_vmem [thread:$0]  (!%p1458_p13), %s1454_s8, 2048, %s1462_s10, %s1464_s12, %s1362_s7, %s1362_s7, %s1363_s9  }
  0x2e   : > { %p914_p9 = scmp.ge.s32.totalorder %s1359_s18, 1  ;;  %p189_p1 = scmp.lt.s32.totalorder %s1359_s18, 3 }
  0x30   : > { %p190_p3 = pnand %p914_p9, %p189_p1 }
  0x31   : > { %s1495_s13 = sand.u32 (!%p190_p3), 1, %s1351_s16  }
  0x32   : > { %193 = sbr.rel (%p190_p3) target bundleno = 420 (0x1a4), region = 28  ;;  %s915_s14 = sshll.u32 (!%p190_p3), %s1495_s13, 7 }
  0x33   : > { %s196_s20 = scalar_lea.sflag (!%p190_p3), [#allocation3], %s1495_s13  ;;  %s1499_s22 = scalar_lea.vmem (!%p190_p3), [#allocation2], %s915_s14 }
  0x39   : > { %1334 = dma.done.wait (%p1434_p6), %s196_s20, 2048  }
  0x3a   : > { %1336 = vsyncadd (%p1434_p6), %s196_s20, 4294965248  ;;  %v303_v0 = vld [vmem:[%s1888_s1] sm:$0xff]  ;;  %v304_v1 = vld [vmem:[%s1888_s1 + $0x8] sm:$0xff]  ;;  %s916_s11 = sshll.u32 %s1412_s19, 5  ;;  %vm544_vm0 = vcmask 64512   ;;  %s918_s29 = sshll.u32 %s1412_s19, 4 }
  0x3b   : > { %v305_v2 = vld [vmem:[%s1888_s1 + $0x10] sm:$0xff]  ;;  %v1130_v3 = vpack.c.bf16 %v304_v1, %v303_v0  ;;  %v306_v4 = vld [vmem:[%s1888_s1 + $0x18] sm:$0xff]  ;;  %v307_v6 = vld [vmem:[%s1888_s1 + $0x20] sm:$0xff]  ;;  %p234_p6 = scmp.lt.s32.totalorder %s916_s11, 63  ;;  %s225_s30 = scalar_lea.vmem [#allocation5], %s1495_s13  ;;  %vm747_vm1 = vcmask 57344  }
  0x3c   : > { %v1134_v5 = vpack.c.bf16 %v306_v4, %v305_v2  ;;  %v308_v7 = vld [vmem:[%s1888_s1 + $0x28] sm:$0xff]  ;;  %v924_v9 = vld [vmem:[%s1499_s22] sm:$0xff]   ;;  %v309_v10 = vld [vmem:[%s1888_s1 + $0x30] sm:$0xff]  ;;  %s776_s26 = sshll.u32 %s225_s30, 4  ;;  %s231_s5 = scalar_lea.vmem [#allocation6], %s1495_s13  ;;  %s1812_s26 = int_to_ptr.vmem [resolvable:$true] %s776_s26 }
  0x3d   : > { %1131 = vmatprep.subr.bf16.mxu0 %v1130_v3  ;;  %1162 = vmatprep.subr.bf16.mxu1 %v1130_v3  ;;  %v1138_v8 = vpack.c.bf16 %v308_v7, %v307_v6  ;;  %v310_v11 = vld [vmem:[%s1888_s1 + $0x38] sm:$0xff]  ;;  %v925_v12 = vunpack.c.l.bf16 %v924_v9  ;;  %v994_v13 = vld [vmem:[%s1499_s22 + $0x40] sm:$0xff]   ;;  %v312_v16 = vld [vmem:[%s1888_s1 + $0x48] sm:$0xff]  ;;  %v926_v30 = vunpack.c.h.bf16 %v924_v9  ;;  %s1906_s11 = smov (!%p234_p6, %s916_s11), 63  ;;  %s789_s6 = sshll.u32 %s231_s5, 4  ;;  %s1820_s6 = int_to_ptr.vmem [resolvable:$true] %s789_s6 }
  0x3e   : > { %1133 = vmatpush3.bf16.msra.mxu0 %v1130_v3  ;;  %1170 = vmatpush3.bf16.msra.mxu1 %v1130_v3  ;;  %v1142_v14 = vpack.c.bf16 %v310_v11, %v309_v10  ;;  %v311_v15 = vld [vmem:[%s1888_s1 + $0x40] sm:$0xff]  ;;  %v957_v17 = vunpack.c.l.bf16 %v994_v13  ;;  %v313_v19 = vld [vmem:[%s1888_s1 + $0x50] sm:$0xff]  ;;  %v314_v20 = vld [vmem:[%s1888_s1 + $0x58] sm:$0xff]  ;;  %v958_v32 = vunpack.c.h.bf16 %v994_v13  ;;  %s1810_s14 = scalar_lea.hbm %s1890_s3, %s918_s29  ;;  %s1818_s8 = scalar_lea.hbm %s1891_s4, %s918_s29 }
  0x3f   : > { %1135 = vmatprep.subr.bf16.mxu0 %v1134_v5  ;;  %1163 = vmatprep.subr.bf16.mxu1 %v1134_v5  ;;  %v1146_v18 = vpack.c.bf16 %v312_v16, %v311_v15  ;;  %v1150_v21 = vpack.c.bf16 %v314_v20, %v313_v19  ;;  %v315_v22 = vld [vmem:[%s1888_s1 + $0x60] sm:$0xff]  ;;  %v316_v23 = vld [vmem:[%s1888_s1 + $0x68] sm:$0xff]  ;;  %v317_v25 = vld [vmem:[%s1888_s1 + $0x70] sm:$0xff]  ;;  %s756_s10 = scalar_lea.sflag [#allocation4], %s1495_s13  ;;  %p1898_p12 = scmp.ne.s32.totalorder %s1895_s27, 0 }
  0x40   : > { %1082 = vmatprep.mubr.f32.mxu0 %v925_v12  ;;  %1106 = vmatprep.mubr.f32.mxu1 %v957_v17  ;;  %v1154_v24 = vpack.c.bf16 %v316_v23, %v315_v22  ;;  %v318_v26 = vld [vmem:[%s1888_s1 + $0x78] sm:$0xff]  ;;  %v987_v28 = vld [vmem:[%s1499_s22 + $0x8] sm:$0xff]   ;;  %v988_v33 = vld [vmem:[%s1499_s22 + $0x10] sm:$0xff]  }
  0x41   : > { %v1158_v27 = vpack.c.bf16 %v318_v26, %v317_v25  ;;  %v995_v29 = vld [vmem:[%s1499_s22 + $0x48] sm:$0xff]   ;;  %v929_v31 = vunpack.c.l.bf16 %v987_v28  ;;  %v996_v35 = vld [vmem:[%s1499_s22 + $0x50] sm:$0xff]   ;;  %v930_v36 = vunpack.c.h.bf16 %v987_v28  ;;  %v933_v37 = vunpack.c.l.bf16 %v988_v33  ;;  %v989_v39 = vld [vmem:[%s1499_s22 + $0x18] sm:$0xff]  }
  0x42   : > { %1137 = vmatpush3.bf16.msra.mxu0 %v1134_v5  ;;  %1171 = vmatpush3.bf16.msra.mxu1 %v1134_v5  ;;  %v961_v34 = vunpack.c.l.bf16 %v995_v29  ;;  %v962_v38 = vunpack.c.h.bf16 %v995_v29  ;;  %v965_v40 = vunpack.c.l.bf16 %v996_v35  ;;  %v997_v41 = vld [vmem:[%s1499_s22 + $0x58] sm:$0xff]   ;;  %v934_v42 = vunpack.c.h.bf16 %v988_v33  ;;  %v990_v45 = vld [vmem:[%s1499_s22 + $0x20] sm:$0xff]   ;;  %v991_v51 = vld [vmem:[%s1499_s22 + $0x28] sm:$0xff]  }
  0x43   : > { %1139 = vmatprep.subr.bf16.mxu0 %v1138_v8  ;;  %1164 = vmatprep.subr.bf16.mxu1 %v1138_v8  ;;  %v937_v43 = vunpack.c.l.bf16 %v989_v39  ;;  %v966_v44 = vunpack.c.h.bf16 %v996_v35  ;;  %v969_v46 = vunpack.c.l.bf16 %v997_v41  ;;  %v998_v47 = vld [vmem:[%s1499_s22 + $0x60] sm:$0xff]   ;;  %v938_v48 = vunpack.c.h.bf16 %v989_v39  ;;  %v999_v53 = vld [vmem:[%s1499_s22 + $0x68] sm:$0xff]   ;;  %v992_v57 = vld [vmem:[%s1499_s22 + $0x30] sm:$0xff]  }
  0x44   : > { %v941_v49 = vunpack.c.l.bf16 %v990_v45  ;;  %v970_v50 = vunpack.c.h.bf16 %v997_v41  ;;  %v973_v52 = vunpack.c.l.bf16 %v998_v47  ;;  %v942_v54 = vunpack.c.h.bf16 %v990_v45  ;;  %v1000_v59 = vld [vmem:[%s1499_s22 + $0x70] sm:$0xff]   ;;  %v993_v63 = vld [vmem:[%s1499_s22 + $0x38] sm:$0xff]  }
  0x45   : > { %v945_v55 = vunpack.c.l.bf16 %v991_v51  ;;  %v974_v56 = vunpack.c.h.bf16 %v998_v47  ;;  %v977_v58 = vunpack.c.l.bf16 %v999_v53  ;;  %v946_v60 = vunpack.c.h.bf16 %v991_v51  ;;  %v1001_v1 = vld [vmem:[%s1499_s22 + $0x78] sm:$0xff]   ;;  %s917_s22 = sshll.u32 %s1906_s11, 3  ;;  %s1261_s11 = scalar_lea.vmem %s1812_s26, 16 }
  0x46   : > { %1141 = vmatpush3.bf16.msra.mxu0 %v1138_v8  ;;  %1172 = vmatpush3.bf16.msra.mxu1 %v1138_v8  ;;  %v949_v61 = vunpack.c.l.bf16 %v992_v57  ;;  %v978_v62 = vunpack.c.h.bf16 %v999_v53  ;;  %v981_v0 = vunpack.c.l.bf16 %v1000_v59  ;;  %v950_v2 = vunpack.c.h.bf16 %v992_v57  ;;  %s1573_s25 = scalar_lea.vmem %s1889_s2, %s917_s22  ;;  %p1262_p11 = scmp.ne.s32.totalorder %s1812_s26, %s1261_s11 }
  0x47   : > { %1143 = vmatprep.subr.bf16.mxu0 %v1142_v14  ;;  %1165 = vmatprep.subr.bf16.mxu1 %v1142_v14  ;;  %v953_v3 = vunpack.c.l.bf16 %v993_v63  ;;  %v982_v4 = vunpack.c.h.bf16 %v1000_v59  ;;  %v985_v5 = vunpack.c.l.bf16 %v1001_v1  ;;  %v954_v6 = vunpack.c.h.bf16 %v993_v63  ;;  %s1364_s22 = smov [#allocation5]  }
  0x48   : > { %v986_v7 = vunpack.c.h.bf16 %v1001_v1  ;;  %p1263_p13 = pnand %p1262_p11, %p1898_p12  ;;  %s1265_s12 = sshll.u32 %s1364_s22, 4  ;;  %s1266_s12 = int_to_ptr.vmem [resolvable:$false] %s1265_s12 }
  0x49   : > { %s1267_s23 = scalar_lea.vmem %s1266_s12, 32  ;;  %p1268_p10 = scmp.lt.s32.totalorder %s1812_s26, %s1266_s12 }
  0x4a   : > { %1145 = vmatpush3.bf16.msra.mxu0 %v1142_v14  ;;  %1173 = vmatpush3.bf16.msra.mxu1 %v1142_v14  ;;  %p1264_p8 = pneg %p1263_p13  ;;  %p1269_p0 = scmp.lt.s32.totalorder %s1267_s23, %s1261_s11 }
  0x4b   : > { %1147 = vmatprep.subr.bf16.mxu0 %v1146_v18  ;;  %1166 = vmatprep.subr.bf16.mxu1 %v1146_v18 }
  0x4c   : > { %p1270_p2 = por %p1269_p0, %p1268_p10 }
  0x4e   : > { %1149 = vmatpush3.bf16.msra.mxu0 %v1146_v18  ;;  %1174 = vmatpush3.bf16.msra.mxu1 %v1146_v18  ;;  %p1271_p4 = pnand %p1270_p2, %p1264_p8 }
  0x4f   : > { %1151 = vmatprep.subr.bf16.mxu0 %v1150_v21  ;;  %1167 = vmatprep.subr.bf16.mxu1 %v1150_v21 }
  0x52   : > { %1153 = vmatpush3.bf16.msra.mxu0 %v1150_v21  ;;  %1175 = vmatpush3.bf16.msra.mxu1 %v1150_v21 }
  0x53   : > { %1155 = vmatprep.subr.bf16.mxu0 %v1154_v24  ;;  %1168 = vmatprep.subr.bf16.mxu1 %v1154_v24 }
  0x56   : > { %1157 = vmatpush3.bf16.msra.mxu0 %v1154_v24  ;;  %1176 = vmatpush3.bf16.msra.mxu1 %v1154_v24 }
  0x57   : > { %1159 = vmatprep.subr.bf16.mxu0 %v1158_v27  ;;  %1169 = vmatprep.subr.bf16.mxu1 %v1158_v27 }
  0x5a   : > { %1161 = vmatpush3.bf16.msra.mxu0 %v1158_v27  ;;  %1177 = vmatpush3.bf16.msra.mxu1 %v1158_v27 }
  0x5d   : > { %1083 = vmatmul.mubr.f32.vlgmr.msra.gmra.mrb[0].mxu0 %v926_v30  ;;  %1107 = vmatmul.mubr.f32.vlgmr.msra.gmra.mrb[0].mxu1 %v958_v32 }
  0x5e   : > { %1085 = vmatprep.mubr.f32.mxu0 %v929_v31  ;;  %1109 = vmatprep.mubr.f32.mxu1 %v961_v34 }
  0x61   : > { %1086 = vmatmul.mubr.f32.gmra.mrb[2].mxu0 %v930_v36  ;;  %1110 = vmatmul.mubr.f32.gmra.mrb[2].mxu1 %v962_v38 }
  0x62   : > { %1088 = vmatprep.mubr.f32.mxu0 %v933_v37  ;;  %1112 = vmatprep.mubr.f32.mxu1 %v965_v40 }
  0x65   : > { %1089 = vmatmul.mubr.f32.gmra.mrb[4].mxu0 %v934_v42  ;;  %1113 = vmatmul.mubr.f32.gmra.mrb[4].mxu1 %v966_v44 }
  0x66   : > { %1091 = vmatprep.mubr.f32.mxu0 %v937_v43  ;;  %1115 = vmatprep.mubr.f32.mxu1 %v969_v46 }
  0x69   : > { %1092 = vmatmul.mubr.f32.gmra.mrb[6].mxu0 %v938_v48  ;;  %1116 = vmatmul.mubr.f32.gmra.mrb[6].mxu1 %v970_v50 }
  0x6a   : > { %1094 = vmatprep.mubr.f32.mxu0 %v941_v49  ;;  %1118 = vmatprep.mubr.f32.mxu1 %v973_v52 }
  0x6d   : > { %1095 = vmatmul.mubr.f32.gmra.mrb[8].mxu0 %v942_v54  ;;  %1119 = vmatmul.mubr.f32.gmra.mrb[8].mxu1 %v974_v56 }
  0x6e   : > { %1097 = vmatprep.mubr.f32.mxu0 %v945_v55  ;;  %1121 = vmatprep.mubr.f32.mxu1 %v977_v58 }
  0x71   : > { %1098 = vmatmul.mubr.f32.gmra.mrb[10].mxu0 %v946_v60  ;;  %1122 = vmatmul.mubr.f32.gmra.mrb[10].mxu1 %v978_v62 }
  0x72   : > { %1100 = vmatprep.mubr.f32.mxu0 %v949_v61  ;;  %1124 = vmatprep.mubr.f32.mxu1 %v981_v0 }
  0x75   : > { %1101 = vmatmul.mubr.f32.gmra.mrb[12].mxu0 %v950_v2  ;;  %1125 = vmatmul.mubr.f32.gmra.mrb[12].mxu1 %v982_v4 }
  0x76   : > { %1103 = vmatprep.mubr.f32.mxu0 %v953_v3  ;;  %1127 = vmatprep.mubr.f32.mxu1 %v985_v5 }
  0x79   : > { %1104 = vmatmul.mubr.f32.gmra.mrb[14].mxu0 %v954_v6  ;;  %1128 = vmatmul.mubr.f32.gmra.mrb[14].mxu1 %v986_v7 }
 0x130   : > { %v1084_v8 = vpop.f32.mrb[0].mxu0  ;;  %v1578_v12 = vpop.f32.mrb[0].mxu1 }
 0x131   : > { %546 = vst.msk [vmem:[%s1573_s25 + $0x8] sm:$0xff] %vm544_vm0, %v1084_v8  ;;  %v578_v9 = vsel %vm544_vm0, %v1084_v8, 0.0  ;;  %v647_v10 = vmul.f32 %v1084_v8, %v1084_v8  ;;  %v385_v11 = vpop.f32.mrb[1].mxu0  ;;  %562 = vst.msk [vmem:[%s1573_s25 + $0x88] sm:$0xff] %vm544_vm0, %v1578_v12  ;;  %v1586_v15 = vpop.f32.mrb[1].mxu1 }
 0x132   : > { %545 = vst.msk [vmem:[%s1573_s25] sm:$0xff] %vm544_vm0, %v385_v11  ;;  %v577_v13 = vsel %vm544_vm0, %v385_v11, 0.0  ;;  %v646_v14 = vmul.f32 %v385_v11, %v385_v11  ;;  %561 = vst.msk [vmem:[%s1573_s25 + $0x80] sm:$0xff] %vm544_vm0, %v1586_v15 }
 0x133   : > { %v679_v16 = vsel %vm544_vm0, %v647_v10, 0.0  ;;  %v579_v17 = vadd.f32 %v578_v9, %v577_v13 }
 0x134   : > { %v678_v18 = vsel %vm544_vm0, %v646_v14, 0.0  ;;  %v1087_v19 = vpop.f32.mrb[2].mxu0  ;;  %v1595_v22 = vpop.f32.mrb[2].mxu1 }
 0x135   : > { %v680_v20 = vadd.f32 %v679_v16, %v678_v18  ;;  %548 = vst.msk [vmem:[%s1573_s25 + $0x18] sm:$0xff] %vm544_vm0, %v1087_v19  ;;  %v395_v21 = vpop.f32.mrb[3].mxu0  ;;  %v649_v23 = vmul.f32 %v1087_v19, %v1087_v19  ;;  %564 = vst.msk [vmem:[%s1573_s25 + $0x98] sm:$0xff] %vm544_vm0, %v1595_v22  ;;  %v1603_v26 = vpop.f32.mrb[3].mxu1  ;;  %v582_v28 = vsel %vm544_vm0, %v1087_v19, 0.0 }
 0x136   : > { %547 = vst.msk [vmem:[%s1573_s25 + $0x10] sm:$0xff] %vm544_vm0, %v395_v21  ;;  %v580_v24 = vsel %vm544_vm0, %v395_v21, 0.0  ;;  %v648_v25 = vmul.f32 %v395_v21, %v395_v21  ;;  %563 = vst.msk [vmem:[%s1573_s25 + $0x90] sm:$0xff] %vm544_vm0, %v1603_v26 }
 0x137   : > { %v581_v27 = vadd.f32 %v580_v24, %v579_v17  ;;  %v683_v35 = vsel %vm544_vm0, %v649_v23, 0.0 }
 0x138   : > { %v681_v29 = vsel %vm544_vm0, %v648_v25, 0.0  ;;  %v1090_v30 = vpop.f32.mrb[4].mxu0  ;;  %v1612_v34 = vpop.f32.mrb[4].mxu1 }
 0x139   : > { %v682_v31 = vadd.f32 %v681_v29, %v680_v20  ;;  %550 = vst.msk [vmem:[%s1573_s25 + $0x28] sm:$0xff] %vm544_vm0, %v1090_v30  ;;  %v405_v32 = vpop.f32.mrb[5].mxu0  ;;  %v583_v33 = vadd.f32 %v582_v28, %v581_v27  ;;  %v651_v36 = vmul.f32 %v1090_v30, %v1090_v30  ;;  %566 = vst.msk [vmem:[%s1573_s25 + $0xa8] sm:$0xff] %vm544_vm0, %v1612_v34  ;;  %v1621_v39 = vpop.f32.mrb[5].mxu1  ;;  %v586_v42 = vsel %vm544_vm0, %v1090_v30, 0.0 }
 0x13a   : > { %549 = vst.msk [vmem:[%s1573_s25 + $0x20] sm:$0xff] %vm544_vm0, %v405_v32  ;;  %v584_v37 = vsel %vm544_vm0, %v405_v32, 0.0  ;;  %v650_v38 = vmul.f32 %v405_v32, %v405_v32  ;;  %565 = vst.msk [vmem:[%s1573_s25 + $0xa0] sm:$0xff] %vm544_vm0, %v1621_v39 }
 0x13b   : > { %v585_v40 = vadd.f32 %v584_v37, %v583_v33  ;;  %v684_v41 = vadd.f32 %v683_v35, %v682_v31  ;;  %v687_v49 = vsel %vm544_vm0, %v651_v36, 0.0 }
 0x13c   : > { %v685_v43 = vsel %vm544_vm0, %v650_v38, 0.0  ;;  %v1093_v44 = vpop.f32.mrb[6].mxu0  ;;  %v1630_v48 = vpop.f32.mrb[6].mxu1 }
 0x13d   : > { %v686_v45 = vadd.f32 %v685_v43, %v684_v41  ;;  %552 = vst.msk [vmem:[%s1573_s25 + $0x38] sm:$0xff] %vm544_vm0, %v1093_v44  ;;  %v415_v46 = vpop.f32.mrb[7].mxu0  ;;  %v587_v47 = vadd.f32 %v586_v42, %v585_v40  ;;  %v653_v50 = vmul.f32 %v1093_v44, %v1093_v44  ;;  %568 = vst.msk [vmem:[%s1573_s25 + $0xb8] sm:$0xff] %vm544_vm0, %v1630_v48  ;;  %v1639_v53 = vpop.f32.mrb[7].mxu1  ;;  %v590_v56 = vsel %vm544_vm0, %v1093_v44, 0.0 }
 0x13e   : > { %551 = vst.msk [vmem:[%s1573_s25 + $0x30] sm:$0xff] %vm544_vm0, %v415_v46  ;;  %v588_v51 = vsel %vm544_vm0, %v415_v46, 0.0  ;;  %v652_v52 = vmul.f32 %v415_v46, %v415_v46  ;;  %567 = vst.msk [vmem:[%s1573_s25 + $0xb0] sm:$0xff] %vm544_vm0, %v1639_v53  ;;  %v662_v46 = vmul.f32 %v1586_v15, %v1586_v15 }
 0x13f   : > { %v589_v54 = vadd.f32 %v588_v51, %v587_v47  ;;  %v688_v55 = vadd.f32 %v687_v49, %v686_v45  ;;  %v691_v63 = vsel %vm544_vm0, %v653_v50, 0.0 }
 0x140   : > { %v689_v57 = vsel %vm544_vm0, %v652_v52, 0.0  ;;  %v1096_v58 = vpop.f32.mrb[8].mxu0  ;;  %v1648_v62 = vpop.f32.mrb[8].mxu1 }
 0x141   : > { %v690_v59 = vadd.f32 %v689_v57, %v688_v55  ;;  %554 = vst.msk [vmem:[%s1573_s25 + $0x48] sm:$0xff] %vm544_vm0, %v1096_v58  ;;  %v425_v60 = vpop.f32.mrb[9].mxu0  ;;  %v591_v61 = vadd.f32 %v590_v56, %v589_v54  ;;  %v655_v0 = vmul.f32 %v1096_v58, %v1096_v58  ;;  %570 = vst.msk [vmem:[%s1573_s25 + $0xc8] sm:$0xff] %vm544_vm0, %v1648_v62  ;;  %v1657_v3 = vpop.f32.mrb[9].mxu1  ;;  %v594_v6 = vsel %vm544_vm0, %v1096_v58, 0.0 }
 0x142   : > { %553 = vst.msk [vmem:[%s1573_s25 + $0x40] sm:$0xff] %vm544_vm0, %v425_v60  ;;  %v592_v1 = vsel %vm544_vm0, %v425_v60, 0.0  ;;  %v654_v2 = vmul.f32 %v425_v60, %v425_v60  ;;  %569 = vst.msk [vmem:[%s1573_s25 + $0xc0] sm:$0xff] %vm544_vm0, %v1657_v3 }
 0x143   : > { %v593_v4 = vadd.f32 %v592_v1, %v591_v61  ;;  %v692_v5 = vadd.f32 %v691_v63, %v690_v59  ;;  %v695_v14 = vsel %vm544_vm0, %v655_v0, 0.0  ;;  %v608_v59 = vsel %vm544_vm0, %v1586_v15, 0.0 }
 0x144   : > { %v693_v7 = vsel %vm544_vm0, %v654_v2, 0.0  ;;  %v1099_v8 = vpop.f32.mrb[10].mxu0  ;;  %v1666_v13 = vpop.f32.mrb[10].mxu1  ;;  %v663_v0 = vmul.f32 %v1578_v12, %v1578_v12  ;;  %v709_v2 = vsel %vm544_vm0, %v662_v46, 0.0  ;;  %v671_v46 = vmul.f32 %v1648_v62, %v1648_v62 }
 0x145   : > { %v694_v9 = vadd.f32 %v693_v7, %v692_v5  ;;  %556 = vst.msk [vmem:[%s1573_s25 + $0x58] sm:$0xff] %vm544_vm0, %v1099_v8  ;;  %v435_v10 = vpop.f32.mrb[11].mxu0  ;;  %v595_v11 = vadd.f32 %v594_v6, %v593_v4  ;;  %v657_v16 = vmul.f32 %v1099_v8, %v1099_v8  ;;  %572 = vst.msk [vmem:[%s1573_s25 + $0xd8] sm:$0xff] %vm544_vm0, %v1666_v13  ;;  %v1675_v19 = vpop.f32.mrb[11].mxu1  ;;  %v598_v23 = vsel %vm544_vm0, %v1099_v8, 0.0 }
 0x146   : > { %555 = vst.msk [vmem:[%s1573_s25 + $0x50] sm:$0xff] %vm544_vm0, %v435_v10  ;;  %v596_v17 = vsel %vm544_vm0, %v435_v10, 0.0  ;;  %v656_v18 = vmul.f32 %v435_v10, %v435_v10  ;;  %571 = vst.msk [vmem:[%s1573_s25 + $0xd0] sm:$0xff] %vm544_vm0, %v1675_v19  ;;  %v664_v4 = vmul.f32 %v1603_v26, %v1603_v26  ;;  %v610_v7 = vsel %vm544_vm0, %v1578_v12, 0.0 }
 0x147   : > { %v597_v20 = vadd.f32 %v596_v17, %v595_v11  ;;  %v696_v21 = vadd.f32 %v695_v14, %v694_v9  ;;  %v699_v31 = vsel %vm544_vm0, %v657_v16, 0.0  ;;  %v612_v8 = vsel %vm544_vm0, %v1603_v26, 0.0 }
 0x148   : > { %v697_v24 = vsel %vm544_vm0, %v656_v18, 0.0  ;;  %v1102_v25 = vpop.f32.mrb[12].mxu0  ;;  %v1684_v30 = vpop.f32.mrb[12].mxu1  ;;  %v711_v11 = vsel %vm544_vm0, %v663_v0, 0.0  ;;  %v665_v14 = vmul.f32 %v1595_v22, %v1595_v22  ;;  %v713_v16 = vsel %vm544_vm0, %v664_v4, 0.0 }
 0x149   : > { %v698_v27 = vadd.f32 %v697_v24, %v696_v21  ;;  %558 = vst.msk [vmem:[%s1573_s25 + $0x68] sm:$0xff] %vm544_vm0, %v1102_v25  ;;  %v445_v28 = vpop.f32.mrb[13].mxu0  ;;  %v599_v29 = vadd.f32 %v598_v23, %v597_v20  ;;  %v659_v32 = vmul.f32 %v1102_v25, %v1102_v25  ;;  %574 = vst.msk [vmem:[%s1573_s25 + $0xe8] sm:$0xff] %vm544_vm0, %v1684_v30  ;;  %v1693_v36 = vpop.f32.mrb[13].mxu1  ;;  %v602_v40 = vsel %vm544_vm0, %v1102_v25, 0.0 }
 0x14a   : > { %557 = vst.msk [vmem:[%s1573_s25 + $0x60] sm:$0xff] %vm544_vm0, %v445_v28  ;;  %v600_v33 = vsel %vm544_vm0, %v445_v28, 0.0  ;;  %v658_v35 = vmul.f32 %v445_v28, %v445_v28  ;;  %573 = vst.msk [vmem:[%s1573_s25 + $0xe0] sm:$0xff] %vm544_vm0, %v1693_v36  ;;  %v666_v17 = vmul.f32 %v1621_v39, %v1621_v39  ;;  %v614_v12 = vsel %vm544_vm0, %v1595_v22, 0.0 }
 0x14b   : > { %v601_v37 = vadd.f32 %v600_v33, %v599_v29  ;;  %v700_v38 = vadd.f32 %v699_v31, %v698_v27  ;;  %v703_v49 = vsel %vm544_vm0, %v659_v32, 0.0  ;;  %v616_v26 = vsel %vm544_vm0, %v1621_v39, 0.0 }
 0x14c   : > { %v701_v41 = vsel %vm544_vm0, %v658_v35, 0.0  ;;  %v1105_v42 = vpop.f32.mrb[14].mxu0  ;;  %v1704_v47 = vpop.f32.mrb[14].mxu1  ;;  %v715_v24 = vsel %vm544_vm0, %v665_v14, 0.0  ;;  %v667_v25 = vmul.f32 %v1612_v34, %v1612_v34  ;;  %v717_v27 = vsel %vm544_vm0, %v666_v17, 0.0 }
 0x14d   : > { %v702_v43 = vadd.f32 %v701_v41, %v700_v38  ;;  %560 = vst.msk [vmem:[%s1573_s25 + $0x78] sm:$0xff] %vm544_vm0, %v1105_v42  ;;  %v455_v44 = vpop.f32.mrb[15].mxu0  ;;  %v603_v45 = vadd.f32 %v602_v40, %v601_v37  ;;  %v661_v50 = vmul.f32 %v1105_v42, %v1105_v42  ;;  %576 = vst.msk [vmem:[%s1573_s25 + $0xf8] sm:$0xff] %vm544_vm0, %v1704_v47  ;;  %v1713_v54 = vpop.f32.mrb[15].mxu1  ;;  %v606_v57 = vsel %vm544_vm0, %v1105_v42, 0.0 }
 0x14e   : > { %559 = vst.msk [vmem:[%s1573_s25 + $0x70] sm:$0xff] %vm544_vm0, %v455_v44  ;;  %v604_v51 = vsel %vm544_vm0, %v455_v44, 0.0  ;;  %v660_v52 = vmul.f32 %v455_v44, %v455_v44  ;;  %575 = vst.msk [vmem:[%s1573_s25 + $0xf0] sm:$0xff] %vm544_vm0, %v1713_v54  ;;  %v677_v60 = vmul.f32 %v1704_v47, %v1704_v47  ;;  %v668_v28 = vmul.f32 %v1639_v53, %v1639_v53 }
 0x14f   : > { %v605_v55 = vadd.f32 %v604_v51, %v603_v45  ;;  %v704_v56 = vadd.f32 %v703_v49, %v702_v43  ;;  %v707_v1 = vsel %vm544_vm0, %v661_v50, 0.0  ;;  %v618_v22 = vsel %vm544_vm0, %v1612_v34, 0.0 }
 0x150   : > { %v705_v58 = vsel %vm544_vm0, %v660_v52, 0.0  ;;  %v1731_v5 = vsel %vm544_vm0, %v677_v60, 0.0  ;;  %v620_v39 = vsel %vm544_vm0, %v1639_v53, 0.0  ;;  %v719_v35 = vsel %vm544_vm0, %v667_v25, 0.0 }
 0x151   : > { %v607_v61 = vadd.f32 %v606_v57, %v605_v55  ;;  %v706_v63 = vadd.f32 %v705_v58, %v704_v56  ;;  %v669_v37 = vmul.f32 %v1630_v48, %v1630_v48  ;;  %v721_v38 = vsel %vm544_vm0, %v668_v28, 0.0 }
 0x152   : > { %v670_v40 = vmul.f32 %v1657_v3, %v1657_v3  ;;  %v622_v34 = vsel %vm544_vm0, %v1630_v48, 0.0  ;;  %v624_v53 = vsel %vm544_vm0, %v1657_v3, 0.0  ;;  %v672_v50 = vmul.f32 %v1675_v19, %v1675_v19 }
 0x153   : > { %v708_v6 = vadd.f32 %v707_v1, %v706_v63  ;;  %v609_v15 = vadd.f32 %v608_v59, %v607_v61  ;;  %v723_v45 = vsel %vm544_vm0, %v669_v37, 0.0  ;;  %v626_v48 = vsel %vm544_vm0, %v1648_v62, 0.0 }
 0x154   : > { %v725_v49 = vsel %vm544_vm0, %v670_v40, 0.0  ;;  %v628_v3 = vsel %vm544_vm0, %v1675_v19, 0.0  ;;  %v727_v57 = vsel %vm544_vm0, %v671_v46, 0.0  ;;  %v673_v58 = vmul.f32 %v1666_v13, %v1666_v13 }
 0x155   : > { %v710_v9 = vadd.f32 %v709_v2, %v708_v6  ;;  %v611_v10 = vadd.f32 %v610_v7, %v609_v15  ;;  %v729_v59 = vsel %vm544_vm0, %v672_v50, 0.0  ;;  %v674_v60 = vmul.f32 %v1693_v36, %v1693_v36 }
 0x156   : > { %v630_v62 = vsel %vm544_vm0, %v1666_v13, 0.0  ;;  %v632_v19 = vsel %vm544_vm0, %v1693_v36, 0.0  ;;  %v731_v2 = vsel %vm544_vm0, %v673_v58, 0.0  ;;  %v675_v4 = vmul.f32 %v1684_v30, %v1684_v30 }
 0x157   : > { %v613_v18 = vadd.f32 %v612_v8, %v611_v10  ;;  %v712_v20 = vadd.f32 %v711_v11, %v710_v9  ;;  %v733_v6 = vsel %vm544_vm0, %v674_v60, 0.0  ;;  %v676_v15 = vmul.f32 %v1713_v54, %v1713_v54 }
 0x158   : > { %v634_v13 = vsel %vm544_vm0, %v1684_v30, 0.0  ;;  %v636_v36 = vsel %vm544_vm0, %v1713_v54, 0.0  ;;  %v735_v11 = vsel %vm544_vm0, %v675_v4, 0.0 }
 0x159   : > { %v714_v21 = vadd.f32 %v713_v16, %v712_v20  ;;  %v615_v23 = vadd.f32 %v614_v12, %v613_v18  ;;  %v737_v14 = vsel %vm544_vm0, %v676_v15, 0.0  ;;  %v638_v18 = vsel %vm544_vm0, %v1704_v47, 0.0 }
 0x15b   : > { %v617_v29 = vadd.f32 %v616_v26, %v615_v23  ;;  %v716_v31 = vadd.f32 %v715_v24, %v714_v21 }
 0x15d   : > { %v718_v32 = vadd.f32 %v717_v27, %v716_v31  ;;  %v619_v33 = vadd.f32 %v618_v22, %v617_v29 }
 0x15f   : > { %v621_v41 = vadd.f32 %v620_v39, %v619_v33  ;;  %v720_v42 = vadd.f32 %v719_v35, %v718_v32 }
 0x161   : > { %v722_v43 = vadd.f32 %v721_v38, %v720_v42  ;;  %v623_v44 = vadd.f32 %v622_v34, %v621_v41 }
 0x163   : > { %v625_v51 = vadd.f32 %v624_v53, %v623_v44  ;;  %v724_v52 = vadd.f32 %v723_v45, %v722_v43 }
 0x165   : > { %v726_v55 = vadd.f32 %v725_v49, %v724_v52  ;;  %v627_v56 = vadd.f32 %v626_v48, %v625_v51 }
 0x167   : > { %v629_v61 = vadd.f32 %v628_v3, %v627_v56  ;;  %v728_v63 = vadd.f32 %v727_v57, %v726_v55 }
 0x169   : > { %v730_v0 = vadd.f32 %v729_v59, %v728_v63  ;;  %v631_v1 = vadd.f32 %v630_v62, %v629_v61 }
 0x16b   : > { %v633_v7 = vadd.f32 %v632_v19, %v631_v1  ;;  %v732_v8 = vadd.f32 %v731_v2, %v730_v0 }
 0x16d   : > { %v734_v9 = vadd.f32 %v733_v6, %v732_v8  ;;  %v635_v10 = vadd.f32 %v634_v13, %v633_v7 }
 0x16f   : > { %v637_v16 = vadd.f32 %v636_v36, %v635_v10  ;;  %v736_v17 = vadd.f32 %v735_v11, %v734_v9 }
 0x171   : > { %v639_v20 = vadd.f32 %v638_v18, %v637_v16  ;;  %v738_v12 = vadd.f32 %v737_v14, %v736_v17 }
 0x173   : > { %v640_v30 = vrot.slane %v639_v20, 4  ;;  %v740_v54 = vadd.f32 %v1731_v5, %v738_v12 }
 0x175   : > { %v641_v26 = vadd.f32 %v640_v30, %v639_v20  ;;  %v741_v21 = vrot.slane %v740_v54, 4 }
 0x177   : > { %v642_v23 = vrot.slane %v641_v26, 2  ;;  %v742_v24 = vadd.f32 %v741_v21, %v740_v54 }
 0x179   : > { %v643_v25 = vadd.f32 %v642_v23, %v641_v26  ;;  %v743_v27 = vrot.slane %v742_v24, 2 }
 0x17b   : > { %v644_v28 = vrot.slane %v643_v25, 1  ;;  %v744_v47 = vadd.f32 %v743_v27, %v742_v24 }
 0x17d   : > { %v645_v29 = vadd.f32 %v644_v28, %v643_v25  ;;  %v745_v31 = vrot.slane %v744_v47, 1 }
 0x17f   : > { %v746_v5 = vadd.f32 %v745_v31, %v744_v47  ;;  %748 = vst.msk [vmem:[%s225_s30] sm:$0x1] %vm747_vm1, %v645_v29 }
 0x180   : > { %1274 = shalt.err (!%p1271_p4)
}
 0x181   : > { %s1275_s25 = scalar_lea.hbm %s1810_s14, 16  ;;  %s1279_s7 = scalar_lea.hbm %s1890_s3, 32 }
 0x182   : > { %p1276_p5 = scmp.ne.s32.totalorder %s1810_s14, %s1275_s25  ;;  %p1280_p1 = scmp.lt.u32.totalorder %s1810_s14, %s1890_s3 }
 0x183   : > { %p1281_p3 = scmp.lt.u32.totalorder %s1279_s7, %s1275_s25  ;;  %p1283_p11 = scmp.lt.u32.totalorder %s1275_s25, %s1810_s14 }
 0x184   : > { %p1277_p7 = pnand %p1276_p5, %p1898_p12 }
 0x185   : > { %p1282_p6 = por %p1281_p3, %p1280_p1 }
 0x186   : > { %p1278_p9 = pneg %p1277_p7 }
 0x187   : > { %p1284_p13 = por %p1283_p11, %p1282_p6 }
 0x189   : > { %p1285_p8 = pnand %p1284_p13, %p1278_p9 }
 0x18b   : > { %1288 = shalt.err (!%p1285_p8)
}
 0x18c   : > { %1180 = dma.vmem_to_hbm [thread:$0]  (%p1898_p12), %s1812_s26, 16, %s1810_s14, %s756_s10   ;;  %749 = vst.msk [vmem:[%s231_s5] sm:$0x1] %vm747_vm1, %v746_v5 }
 0x18d   : > { %s760_s20 = scalar_lea.sflag [#allocation7], %s1495_s13  ;;  %s1289_s11 = scalar_lea.vmem %s1820_s6, 16 }
 0x18e   : > { %p1290_p10 = scmp.ne.s32.totalorder %s1820_s6, %s1289_s11  ;;  %s1365_s22 = smov [#allocation6]  }
 0x18f   : > { %s1293_s12 = sshll.u32 %s1365_s22, 4  ;;  %s1294_s12 = int_to_ptr.vmem [resolvable:$false] %s1293_s12 }
 0x190   : > { %p1291_p0 = pnand %p1290_p10, %p1898_p12  ;;  %s1295_s23 = scalar_lea.vmem %s1294_s12, 32 }
 0x191   : > { %p1296_p4 = scmp.lt.s32.totalorder %s1820_s6, %s1294_s12  ;;  %p1297_p5 = scmp.lt.s32.totalorder %s1295_s23, %s1289_s11 }
 0x192   : > { %p1292_p2 = pneg %p1291_p0 }
 0x193   : > { %p1298_p7 = por %p1297_p5, %p1296_p4 }
 0x195   : > { %p1299_p9 = pnand %p1298_p7, %p1292_p2 }
 0x197   : > { %1302 = shalt.err (!%p1299_p9)
}
 0x198   : > { %s1303_s13 = scalar_lea.hbm %s1818_s8, 16  ;;  %s1307_s14 = scalar_lea.hbm %s1891_s4, 32 }
 0x199   : > { %p1304_p1 = scmp.ne.s32.totalorder %s1818_s8, %s1303_s13  ;;  %p1308_p11 = scmp.lt.u32.totalorder %s1818_s8, %s1891_s4 }
 0x19a   : > { %p1309_p13 = scmp.lt.u32.totalorder %s1307_s14, %s1303_s13  ;;  %p1311_p10 = scmp.lt.u32.totalorder %s1303_s13, %s1818_s8 }
 0x19b   : > { %p1305_p3 = pnand %p1304_p1, %p1898_p12 }
 0x19c   : > { %p1310_p8 = por %p1309_p13, %p1308_p11 }
 0x19d   : > { %p1306_p6 = pneg %p1305_p3 }
 0x19e   : > { %p1312_p0 = por %p1311_p10, %p1310_p8 }
 0x1a0   : > { %p1313_p2 = pnand %p1312_p0, %p1306_p6 }
 0x1a2   : > { %1316 = shalt.err (!%p1313_p2)
}
 0x1a3   : > { %1181 = dma.vmem_to_hbm [thread:$0]  (%p1898_p12), %s1820_s6, 16, %s1818_s8, %s760_s20  }
 0x1a4 PF: > { %s809_s29 = sand.u32 1, %s1347_s15   ;;  %p1899_p4 = scmp.ne.s32.totalorder %s1896_s28, 0 }
 0x1a5   : > { %p1900_p5 = scmp.ge.s32.totalorder %s1359_s18, 2  ;;  %s810_s30 = scalar_lea.sflag [#allocation4], %s809_s29 }
 0x1a7   : > { %p1189_p7 = pnand %p1900_p5, %p1899_p4 }
 0x1a9   : > { %1338 = dma.done.wait (!%p1189_p7), %s810_s30, 16  }
 0x1aa   : > { %1340 = vsyncadd (!%p1189_p7), %s810_s30, 4294967280  ;;  %s818_s7 = scalar_lea.sflag [#allocation7], %s809_s29 }
 0x1ab   : > { %1342 = dma.done.wait (!%p1189_p7), %s818_s7, 16  }
 0x1ac   : > { %1344 = vsyncadd (!%p1189_p7), %s818_s7, 4294967280  ;;  %p21_p12 = scmp.ge.s32.totalorder %s1416_s21, 4   ;;  %s1901_s15 = smov %s1351_s16 }
 0x1ad   : > { %s1902_s16 = smov %s1355_s17  ;;  %s1903_s17 = smov %s1428_s24 }
 0x1ae   : > { %s1904_s18 = smov %s1416_s21  ;;  %23 = sbr.rel (!%p21_p12) target bundleno = 7 (0x7), region = 102 }
 0x1b5   :  { %822 = vsyncpa [#allocation3], 1 }
 0x1b6   :  { %824 = vsyncpa [#allocation3 + $0x1], 1 }
 0x1b7   :  { %825 = vsyncpa [#allocation4], 1 }
 0x1b8   :  { %827 = vsyncpa [#allocation4 + $0x1], 1 }
 0x1b9   :  { %828 = vsyncpa [#allocation7], 1 }
 0x1ba   :  { %830 = vsyncpa [#allocation7 + $0x1], 1 }

</bundles_post_ra>
